<compile_context>
chip_gen: v6e
topology: v6e:2x2x1
jax: 0.10.0
libtpu: 0.0.40
codegen_flags: <defaults>
</compile_context>

<pallas_src>
import functools

import jax
import jax.numpy as jnp
from jax.experimental import pallas as pl
from jax.experimental.pallas import tpu as pltpu


# ---------------------------------------------------------------------------
# Small host-side helpers.
# ---------------------------------------------------------------------------
def _cdiv(a, b):
    return -(-a // b)


def _round_up(x, m):
    return _cdiv(x, m) * m


def _pick_chunk(c):
    # ~32 KiB per live (C, chunk) f32 tile (~8 vregs): two accumulators plus the
    # streamed load stay far under the 64-vreg file even for large C.
    lanes = ((32 << 10) // max(1, c * 4)) // 128 * 128
    return int(max(128, min(1024, lanes)))


def _tpu_vmem_bytes():
    try:
        v = int(pltpu.get_tpu_info().vmem_capacity_bytes)
        if v > 0:
            return v
    except Exception:
        pass
    return 64 << 20  # conservative fallback (v7x per-TensorCore)


def _num_tensorcores():
    try:
        info = pltpu.get_tpu_info()
        for name in ("num_cores", "core_count", "num_tensorcores", "num_tensor_cores"):
            v = getattr(info, name, None)
            if v:
                return int(v)
    except Exception:
        pass
    return 1


def _vmem_limit(need_bytes, vmem_cap):
    # Ask for what the pipeline actually needs (plus headroom), clamped to a
    # safe fraction of physical VMEM; never below the 16 MiB v5e default.
    lo = 16 << 20
    hi = max(lo, min(int(vmem_cap) * 3 // 4, 100 << 20))
    return int(min(hi, max(lo, int(need_bytes))))


def _spatial_tiling(hw, c, itemsize, max_tile_bytes):
    # Choose n_tiles first, then the tile, so padding waste is <= 127 lanes.
    lanes_target = max(128, (max_tile_bytes // max(1, c * itemsize)) // 128 * 128)
    n_tiles = max(1, _cdiv(_round_up(hw, 128), lanes_target))
    hw_tile = _round_up(_cdiv(hw, n_tiles), 128)
    n_tiles = _cdiv(hw, hw_tile)
    return hw_tile, n_tiles


# ---------------------------------------------------------------------------
# In-kernel building blocks (shared by the fused and two-pass kernels).
# ---------------------------------------------------------------------------
def _pool_columns(x_ref, length, chunk):
    """Streaming (sum, max) over x_ref[:, :length] -> two (C, 1) f32 columns.

    Elementwise (VPU) accumulation across lane-chunks, single cross-lane (XLU)
    reduction at the end.  The ragged tail is read with an exact-size slice,
    so no masking is ever required.
    """
    C = x_ref.shape[0]
    n_full = length // chunk
    rem = length - n_full * chunk

    s_col = jnp.zeros((C, 1), jnp.float32)
    m_col = jnp.full((C, 1), -jnp.inf, jnp.float32)

    if n_full > 0:
        s0 = jnp.zeros((C, chunk), jnp.float32)
        m0 = jnp.full((C, chunk), -jnp.inf, jnp.float32)
        if n_full <= 8:  # fully unrolled: vld/vadd/vmax co-issue under the DMA shadow
            s_acc, m_acc = s0, m0
            for i in range(n_full):
                xc = x_ref[:, pl.ds(i * chunk, chunk)].astype(jnp.float32)
                s_acc = s_acc + xc
                m_acc = jnp.maximum(m_acc, xc)
        else:
            def body(i, carry):
                sa, ma = carry
                start = pl.multiple_of(i * chunk, 128)
                xc = x_ref[:, pl.ds(start, chunk)].astype(jnp.float32)
                return sa + xc, jnp.maximum(ma, xc)

            s_acc, m_acc = jax.lax.fori_loop(0, n_full, body, (s0, m0))
        s_col = jnp.sum(s_acc, axis=-1, keepdims=True)
        m_col = jnp.max(m_acc, axis=-1, keepdims=True)

    if rem > 0:
        xt = x_ref[:, pl.ds(n_full * chunk, rem)].astype(jnp.float32)
        s_col = s_col + jnp.sum(xt, axis=-1, keepdims=True)
        m_col = jnp.maximum(m_col, jnp.max(xt, axis=-1, keepdims=True))
    return s_col, m_col


def _mlp_scale(s_col, m_col, w1_ref, b1_ref, w2_ref, b2_ref, hw):
    """sigmoid(MLP(avg) + MLP(max)) as a (C, 1) f32 column.

    Shares the second Linear between the two branches:
      att = w2 @ (relu(w1@avg + b1) + relu(w1@mx + b1)) + 2*b2
    """
    w1 = w1_ref[...]
    b1 = b1_ref[...]
    w2 = w2_ref[...]
    b2 = b2_ref[...]
    avg = s_col * (1.0 / hw)
    h = (jnp.maximum(jnp.dot(w1, avg, preferred_element_type=jnp.float32) + b1, 0.0)
         + jnp.maximum(jnp.dot(w1, m_col, preferred_element_type=jnp.float32) + b1, 0.0))
    att = jnp.dot(w2, h, preferred_element_type=jnp.float32) + 2.0 * b2
    return jax.nn.sigmoid(att)


def _stream_gate(x_ref, o_ref, scale_col, length, chunk):
    """o[:, :length] = x[:, :length] * scale_col, f32 math, store in o dtype."""
    C = x_ref.shape[0]
    n_full = length // chunk
    rem = length - n_full * chunk

    if n_full > 0:
        # Hoisted broadcast (JAX does not CSE broadcast_in_dim inside loops).
        scale_wide = jnp.broadcast_to(scale_col, (C, chunk))

        def gate_full(start):
            xv = x_ref[:, pl.ds(start, chunk)].astype(jnp.float32)
            o_ref[:, pl.ds(start, chunk)] = (xv * scale_wide).astype(o_ref.dtype)

        if n_full <= 8:
            for i in range(n_full):
                gate_full(i * chunk)
        else:
            @pl.loop(0, n_full)
            def _(i):
                gate_full(pl.multiple_of(i * chunk, 128))

    if rem > 0:
        start = n_full * chunk
        xv = x_ref[:, pl.ds(start, rem)].astype(jnp.float32)
        o_ref[:, pl.ds(start, rem)] = (xv * scale_col).astype(o_ref.dtype)


# ---------------------------------------------------------------------------
# Fast path: single fused kernel, grid over batch only (1 read + 1 write of x).
# ---------------------------------------------------------------------------
def _fused_kernel(x_ref, w1_ref, b1_ref, w2_ref, b2_ref, o_ref, *, hw, chunk):
    # x_ref/o_ref: (C, HW); w1: (Ch, C); b1: (Ch, 1); w2: (C, Ch); b2: (C, 1)
    s_col, m_col = _pool_columns(x_ref, hw, chunk)
    scale = _mlp_scale(s_col, m_col, w1_ref, b1_ref, w2_ref, b2_ref, hw)
    _stream_gate(x_ref, o_ref, scale, hw, chunk)


def _channel_gate_fused(x3, w1, b1c, w2, b2c, hw, *, vmem_limit):
    B, C, _ = x3.shape
    Ch = w1.shape[0]
    chunk = _pick_chunk(C)
    kernel = functools.partial(_fused_kernel, hw=hw, chunk=chunk)
    return pl.pallas_call(
        kernel,
        out_shape=jax.ShapeDtypeStruct((B, C, hw), x3.dtype),
        grid=(B,),
        in_specs=[
            # Full-extent last two dims: exempt from the (8,128) rule, no pad.
            pl.BlockSpec((None, C, hw), lambda b: (b, 0, 0)),
            # Constant index maps: weights/biases DMA'd once, stay resident.
            pl.BlockSpec((Ch, C), lambda b: (0, 0)),
            pl.BlockSpec((Ch, 1), lambda b: (0, 0)),
            pl.BlockSpec((C, Ch), lambda b: (0, 0)),
            pl.BlockSpec((C, 1), lambda b: (0, 0)),
        ],
        out_specs=pl.BlockSpec((None, C, hw), lambda b: (b, 0, 0)),
        compiler_params=pltpu.CompilerParams(
            dimension_semantics=("parallel",),
            vmem_limit_bytes=vmem_limit),
    )(x3, w1, b1c, w2, b2c)


# ---------------------------------------------------------------------------
# Big-slab path: pass 1 = pooling + MLP (reduction over spatial tiles),
# pass 2 = elementwise gating (fully parallel grid).
# ---------------------------------------------------------------------------
def _pool_kernel(x_ref, w1_ref, b1_ref, w2_ref, b2_ref, scale_ref, s_acc, m_acc,
                 *, hw, hw_tile, n_tiles, chunk):
    s = pl.program_id(1)
    tail_len = hw - (n_tiles - 1) * hw_tile   # valid lanes in the last tile
    ragged = tail_len != hw_tile

    @pl.when(s == 0)
    def _():
        s_acc[...] = jnp.zeros_like(s_acc)
        m_acc[...] = jnp.full_like(m_acc, -jnp.inf)

    def accumulate(length):
        sc, mc = _pool_columns(x_ref, length, chunk)
        s_acc[...] = s_acc[...] + sc
        m_acc[...] = jnp.maximum(m_acc[...], mc)

    if not ragged:
        accumulate(hw_tile)
    else:
        # Only the boundary tile is special: read just its valid prefix
        # (the rest of that block is unspecified padding).
        @pl.when(s < n_tiles - 1)
        def _():
            accumulate(hw_tile)

        @pl.when(s == n_tiles - 1)
        def _():
            accumulate(tail_len)

    # MLP + sigmoid exactly once per batch element, after the last tile.
    @pl.when(s == n_tiles - 1)
    def _():
        scale_ref[...] = _mlp_scale(s_acc[...], m_acc[...],
                                    w1_ref, b1_ref, w2_ref, b2_ref, hw)


def _gate_kernel(x_ref, scale_ref, o_ref, *, chunk):
    # OOB lanes of the boundary tile produce garbage that is dropped on writeback.
    _stream_gate(x_ref, o_ref, scale_ref[...], x_ref.shape[1], chunk)


def _channel_gate_two_pass(x3, w1, b1c, w2, b2c, hw, hw_tile, n_tiles, *, vmem_cap):
    B, C, _ = x3.shape
    Ch = w1.shape[0]
    itemsize = jnp.dtype(x3.dtype).itemsize
    chunk = _pick_chunk(C)
    tile_bytes = C * hw_tile * itemsize
    weights_bytes = 4 * int(w1.size + b1c.size + w2.size + b2c.size)

    pool = functools.partial(_pool_kernel, hw=hw, hw_tile=hw_tile,
                             n_tiles=n_tiles, chunk=chunk)
    scale = pl.pallas_call(
        pool,
        out_shape=jax.ShapeDtypeStruct((B, C, 1), jnp.float32),
        grid=(B, n_tiles),
        in_specs=[
            pl.BlockSpec((None, C, hw_tile), lambda b, s: (b, 0, s)),
            pl.BlockSpec((Ch, C), lambda b, s: (0, 0)),
            pl.BlockSpec((Ch, 1), lambda b, s: (0, 0)),
            pl.BlockSpec((C, Ch), lambda b, s: (0, 0)),
            pl.BlockSpec((C, 1), lambda b, s: (0, 0)),
        ],
        out_specs=pl.BlockSpec((None, C, 1), lambda b, s: (b, 0, 0)),
        scratch_shapes=[pltpu.VMEM((C, 1), jnp.float32),
                        pltpu.VMEM((C, 1), jnp.float32)],
        compiler_params=pltpu.CompilerParams(
            dimension_semantics=("parallel", "arbitrary"),
            vmem_limit_bytes=_vmem_limit(
                2 * tile_bytes + 2 * weights_bytes + (2 << 20), vmem_cap)),
    )(x3, w1, b1c, w2, b2c)

    gate = functools.partial(_gate_kernel, chunk=chunk)
    return pl.pallas_call(
        gate,
        out_shape=jax.ShapeDtypeStruct((B, C, hw), x3.dtype),
        grid=(B, n_tiles),
        in_specs=[
            pl.BlockSpec((None, C, hw_tile), lambda b, s: (b, 0, s)),
            pl.BlockSpec((None, C, 1), lambda b, s: (b, 0, 0)),
        ],
        out_specs=pl.BlockSpec((None, C, hw_tile), lambda b, s: (b, 0, s)),
        compiler_params=pltpu.CompilerParams(
            dimension_semantics=("parallel", "parallel"),
            vmem_limit_bytes=_vmem_limit(4 * tile_bytes + (2 << 20), vmem_cap)),
    )(x3, scale)


# ---------------------------------------------------------------------------
# Public wrapper.
# ---------------------------------------------------------------------------
def channel_gate(x_nchw, w1, b1, w2, b2, *, max_slab_bytes=None, max_tile_bytes=None):
    """CBAM ChannelGate forward.

    x_nchw: (B, C, H, W), any float dtype (output keeps the input dtype).
    Params in PyTorch nn.Linear (out, in) layout:
      w1: (C//r, C), b1: (C//r,), w2: (C, C//r), b2: (C,).
    """
    B, C, H, W = x_nchw.shape
    HW = H * W
    x3 = x_nchw.reshape(B, C, HW)                 # layout-preserving view; no cast
    w1 = w1.astype(jnp.float32)
    w2 = w2.astype(jnp.float32)
    b1c = b1.reshape(-1, 1).astype(jnp.float32)
    b2c = b2.reshape(-1, 1).astype(jnp.float32)

    itemsize = jnp.dtype(x_nchw.dtype).itemsize
    vmem_cap = _tpu_vmem_bytes()
    weights_bytes = 4 * int(w1.size + b1c.size + w2.size + b2c.size)
    slab_bytes = C * HW * itemsize

    if max_slab_bytes is None:
        # 2x-in + 2x-out double buffering + weights + internal scratch headroom.
        max_slab_bytes = vmem_cap // 6

    # Keep both v7x TensorCores busy when the batch alone cannot (fused grid=(B,)).
    prefer_two_pass = (B < 2) and (_num_tensorcores() >= 2) and (slab_bytes >= (2 << 20))

    if slab_bytes <= max_slab_bytes and not prefer_two_pass:
        need = 4 * slab_bytes + 2 * weights_bytes + (2 << 20)
        out3 = _channel_gate_fused(x3, w1, b1c, w2, b2c, HW,
                                   vmem_limit=_vmem_limit(need, vmem_cap))
    else:
        if max_tile_bytes is None:
            max_tile_bytes = max(1 << 20, min(8 << 20, vmem_cap // 16))
            if prefer_two_pass:
                # Ensure >= 2 spatial tiles so the parallel gate grid feeds both cores.
                max_tile_bytes = min(max_tile_bytes,
                                     max(C * 128 * itemsize, slab_bytes // 2))
        hw_tile, n_tiles = _spatial_tiling(HW, C, itemsize, max_tile_bytes)
        out3 = _channel_gate_two_pass(x3, w1, b1c, w2, b2c, HW, hw_tile, n_tiles,
                                      vmem_cap=vmem_cap)

    return out3.reshape(B, C, H, W)


def channel_gate_ref(x_nchw, w1, b1, w2, b2):
    """Pure-JAX reference mirroring the PyTorch forward (weights in (out,in))."""
    xf = x_nchw.astype(jnp.float32)
    avg = jnp.mean(xf, axis=(2, 3))
    mx = jnp.max(xf, axis=(2, 3))

    def mlp(v):
        h = jnp.maximum(v @ w1.T + b1, 0.0)
        return h @ w2.T + b2

    att = mlp(avg) + mlp(mx)
    return xf * jax.nn.sigmoid(att)[:, :, None, None]


if __name__ == "__main__":
    # Shapes consistent with the module: gate_channels=32, reduction_ratio=16.
    B, C = 2, 32
    reduction_ratio = 16
    Ch = C // reduction_ratio

    key = jax.random.PRNGKey(0)
    kx, k1, k2, k3, k4, kx2, kx3 = jax.random.split(key, 7)

    # PyTorch nn.Linear layout: weight (out, in), bias (out,)
    w1 = jax.random.normal(k1, (Ch, C), dtype=jnp.float32) * 0.1
    b1 = jax.random.normal(k2, (Ch,), dtype=jnp.float32) * 0.1
    w2 = jax.random.normal(k3, (C, Ch), dtype=jnp.float32) * 0.1
    b2 = jax.random.normal(k4, (C,), dtype=jnp.float32) * 0.1

    # 1) Fused path, lane-aligned spatial (16x16 = 256).
    x = jax.random.normal(kx, (B, C, 16, 16), dtype=jnp.float32)
    out = jax.block_until_ready(channel_gate(x, w1, b1, w2, b2))
    ref = channel_gate_ref(x, w1, b1, w2, b2)
    assert out.shape == x.shape and out.dtype == x.dtype
    assert jnp.allclose(out, ref, atol=1e-5, rtol=1e-5)

    # 2) Fused path with a ragged spatial extent (13x13 = 169, no padding at all).
    x2 = jax.random.normal(kx2, (B, C, 13, 13), dtype=jnp.float32)
    ref2 = channel_gate_ref(x2, w1, b1, w2, b2)
    out2 = jax.block_until_ready(channel_gate(x2, w1, b1, w2, b2))
    assert jnp.allclose(out2, ref2, atol=1e-5, rtol=1e-5)

    # 3) Forced two-pass path with multiple (ragged) spatial tiles.
    out3 = jax.block_until_ready(
        channel_gate(x2, w1, b1, w2, b2, max_slab_bytes=0, max_tile_bytes=128 * C * 4))
    assert jnp.allclose(out3, ref2, atol=1e-5, rtol=1e-5)

    # 4) Fused path exercising the chunked streaming loop + ragged tail (40x40).
    x3 = jax.random.normal(kx3, (B, C, 40, 40), dtype=jnp.float32)
    ref3 = channel_gate_ref(x3, w1, b1, w2, b2)
    out4 = jax.block_until_ready(channel_gate(x3, w1, b1, w2, b2))
    assert jnp.allclose(out4, ref3, atol=1e-5, rtol=1e-5)

    # 5) bf16 I/O mode (halves HBM bytes; math still f32, output stays bf16).
    xb = x.astype(jnp.bfloat16)
    outb = jax.block_until_ready(channel_gate(xb, w1, b1, w2, b2))
    refb = channel_gate_ref(xb, w1, b1, w2, b2)
    assert outb.dtype == jnp.bfloat16
    assert jnp.allclose(outb.astype(jnp.float32), refb, atol=3e-2, rtol=3e-2)

    print("KERNEL_OK")
</pallas_src>

<mosaic_0001>
module attributes {stable_mosaic.version = 11 : i64} {
  func.func @_fused_kernel(%arg0: i32, %arg1: memref<1x32x256xf32, #tpu.memory_space<vmem>>, %arg2: memref<2x32xf32, #tpu.memory_space<vmem>>, %arg3: memref<2x1xf32, #tpu.memory_space<vmem>>, %arg4: memref<32x2xf32, #tpu.memory_space<vmem>>, %arg5: memref<32x1xf32, #tpu.memory_space<vmem>>, %arg6: memref<1x32x256xf32, #tpu.memory_space<vmem>>) attributes {dimension_semantics = [#tpu.dimension_semantics<parallel>], iteration_bounds = array<i64: 2>, scalar_prefetch = 0 : i64, scratch_operands = 0 : i64, tpu.core_type = #tpu.core_type<tc>, window_params = [{transform_indices = @transform_0, window_bounds = array<i64: 1, 32, 256>}, {pipeline_mode = #tpu.pipeline_mode<synchronous>, transform_indices = @transform_1, window_bounds = array<i64: 2, 32>}, {pipeline_mode = #tpu.pipeline_mode<synchronous>, transform_indices = @transform_2, window_bounds = array<i64: 2, 1>}, {pipeline_mode = #tpu.pipeline_mode<synchronous>, transform_indices = @transform_3, window_bounds = array<i64: 32, 2>}, {pipeline_mode = #tpu.pipeline_mode<synchronous>, transform_indices = @transform_4, window_bounds = array<i64: 32, 1>}, {transform_indices = @transform_5, window_bounds = array<i64: 1, 32, 256>}]} {
    %cst = arith.constant 0.000000e+00 : f32
    %0 = vector.broadcast %cst : f32 to vector<32x256xf32>
    %cst_0 = arith.constant 0xFF800000 : f32
    %1 = vector.broadcast %cst_0 : f32 to vector<32x256xf32>
    %c0 = arith.constant 0 : index
    %c0_1 = arith.constant 0 : index
    %c0_2 = arith.constant 0 : index
    %2 = vector.load %arg1[%c0, %c0_1, %c0_2] : memref<1x32x256xf32, #tpu.memory_space<vmem>>, vector<1x32x256xf32>
    %3 = vector.shape_cast %2 : vector<1x32x256xf32> to vector<32x256xf32>
    %4 = arith.addf %0, %3 : vector<32x256xf32>
    %5 = arith.maximumf %1, %3 : vector<32x256xf32>
    %cst_3 = arith.constant dense<0.000000e+00> : vector<32xf32>
    %6 = vector.multi_reduction <add>, %4, %cst_3 [1] : vector<32x256xf32> to vector<32xf32>
    %7 = vector.shape_cast %6 : vector<32xf32> to vector<32x1xf32>
    %cst_4 = arith.constant dense<0xFF800000> : vector<32xf32>
    %8 = vector.multi_reduction <maximumf>, %5, %cst_4 [1] : vector<32x256xf32> to vector<32xf32>
    %9 = vector.shape_cast %8 : vector<32xf32> to vector<32x1xf32>
    %c0_5 = arith.constant 0 : index
    %c0_6 = arith.constant 0 : index
    %10 = vector.load %arg2[%c0_5, %c0_6] : memref<2x32xf32, #tpu.memory_space<vmem>>, vector<2x32xf32>
    %c0_7 = arith.constant 0 : index
    %c0_8 = arith.constant 0 : index
    %11 = vector.load %arg3[%c0_7, %c0_8] : memref<2x1xf32, #tpu.memory_space<vmem>>, vector<2x1xf32>
    %c0_9 = arith.constant 0 : index
    %c0_10 = arith.constant 0 : index
    %12 = vector.load %arg4[%c0_9, %c0_10] : memref<32x2xf32, #tpu.memory_space<vmem>>, vector<32x2xf32>
    %c0_11 = arith.constant 0 : index
    %c0_12 = arith.constant 0 : index
    %13 = vector.load %arg5[%c0_11, %c0_12] : memref<32x1xf32, #tpu.memory_space<vmem>>, vector<32x1xf32>
    %cst_13 = arith.constant 3.906250e-03 : f32
    %14 = vector.broadcast %cst_13 : f32 to vector<32x1xf32>
    %15 = arith.mulf %7, %14 : vector<32x1xf32>
    %cst_14 = arith.constant dense<0.000000e+00> : vector<2x1xf32>
    %16 = tpu.matmul %10, %15, %cst_14 {dimension_numbers = #tpu.dot_dimension_numbers<[1], [0], [0], [1], [0, 0, 1, 1], [], []>} : vector<2x32xf32>, vector<32x1xf32>, vector<2x1xf32> -> vector<2x1xf32>
    %17 = arith.addf %16, %11 : vector<2x1xf32>
    %cst_15 = arith.constant 0.000000e+00 : f32
    %18 = vector.broadcast %cst_15 : f32 to vector<2x1xf32>
    %19 = arith.maximumf %17, %18 : vector<2x1xf32>
    %cst_16 = arith.constant dense<0.000000e+00> : vector<2x1xf32>
    %20 = tpu.matmul %10, %9, %cst_16 {dimension_numbers = #tpu.dot_dimension_numbers<[1], [0], [0], [1], [0, 0, 1, 1], [], []>} : vector<2x32xf32>, vector<32x1xf32>, vector<2x1xf32> -> vector<2x1xf32>
    %21 = arith.addf %20, %11 : vector<2x1xf32>
    %cst_17 = arith.constant 0.000000e+00 : f32
    %22 = vector.broadcast %cst_17 : f32 to vector<2x1xf32>
    %23 = arith.maximumf %21, %22 : vector<2x1xf32>
    %24 = arith.addf %19, %23 : vector<2x1xf32>
    %cst_18 = arith.constant dense<0.000000e+00> : vector<32x1xf32>
    %25 = tpu.matmul %12, %24, %cst_18 {dimension_numbers = #tpu.dot_dimension_numbers<[1], [0], [0], [1], [0, 0, 1, 1], [], []>} : vector<32x2xf32>, vector<2x1xf32>, vector<32x1xf32> -> vector<32x1xf32>
    %cst_19 = arith.constant 2.000000e+00 : f32
    %26 = vector.broadcast %cst_19 : f32 to vector<32x1xf32>
    %27 = arith.mulf %26, %13 : vector<32x1xf32>
    %28 = arith.addf %25, %27 : vector<32x1xf32>
    %29 = arith.negf %28 : vector<32x1xf32>
    %30 = math.exp %29 : vector<32x1xf32>
    %cst_20 = arith.constant 1.000000e+00 : f32
    %31 = vector.broadcast %cst_20 : f32 to vector<32x1xf32>
    %32 = arith.addf %31, %30 : vector<32x1xf32>
    %33 = arith.divf %31, %32 : vector<32x1xf32>
    %34 = vector.shape_cast %33 : vector<32x1xf32> to vector<32x1xf32>
    %35 = vector.broadcast %34 : vector<32x1xf32> to vector<32x256xf32>
    %c0_21 = arith.constant 0 : index
    %c0_22 = arith.constant 0 : index
    %c0_23 = arith.constant 0 : index
    %36 = vector.load %arg1[%c0_21, %c0_22, %c0_23] : memref<1x32x256xf32, #tpu.memory_space<vmem>>, vector<1x32x256xf32>
    %37 = vector.shape_cast %36 : vector<1x32x256xf32> to vector<32x256xf32>
    %38 = arith.mulf %37, %35 : vector<32x256xf32>
    %c0_24 = arith.constant 0 : index
    %c0_25 = arith.constant 0 : index
    %c0_26 = arith.constant 0 : index
    %39 = vector.load %arg6[%c0_24, %c0_25, %c0_26] : memref<1x32x256xf32, #tpu.memory_space<vmem>>, vector<1x32x256xf32>
    %40 = vector.shape_cast %39 : vector<1x32x256xf32> to vector<32x256xf32>
    %41 = vector.shape_cast %38 : vector<32x256xf32> to vector<1x32x256xf32>
    tpu.vector_store %arg6[%c0_24, %c0_25, %c0_26], %41 {strides = array<i32>} : memref<1x32x256xf32, #tpu.memory_space<vmem>>, vector<1x32x256xf32>,
    return
  }
  func.func @transform_0(%arg0: i32) -> (i32, i32, i32) {
    %c0_i32 = arith.constant 0 : i32
    %c0_i32_0 = arith.constant 0 : i32
    %c0_i32_1 = arith.constant 0 : i32
    return %arg0, %c0_i32, %c0_i32_0 : i32, i32, i32
  }
  func.func @transform_1(%arg0: i32) -> (i32, i32) {
    %c0_i32 = arith.constant 0 : i32
    %c0_i32_0 = arith.constant 0 : i32
    %c0_i32_1 = arith.constant 0 : i32
    return %c0_i32, %c0_i32_0 : i32, i32
  }
  func.func @transform_2(%arg0: i32) -> (i32, i32) {
    %c0_i32 = arith.constant 0 : i32
    %c0_i32_0 = arith.constant 0 : i32
    %c0_i32_1 = arith.constant 0 : i32
    return %c0_i32, %c0_i32_0 : i32, i32
  }
  func.func @transform_3(%arg0: i32) -> (i32, i32) {
    %c0_i32 = arith.constant 0 : i32
    %c0_i32_0 = arith.constant 0 : i32
    %c0_i32_1 = arith.constant 0 : i32
    return %c0_i32, %c0_i32_0 : i32, i32
  }
  func.func @transform_4(%arg0: i32) -> (i32, i32) {
    %c0_i32 = arith.constant 0 : i32
    %c0_i32_0 = arith.constant 0 : i32
    %c0_i32_1 = arith.constant 0 : i32
    return %c0_i32, %c0_i32_0 : i32, i32
  }
  func.func @transform_5(%arg0: i32) -> (i32, i32, i32) {
    %c0_i32 = arith.constant 0 : i32
    %c0_i32_0 = arith.constant 0 : i32
    %c0_i32_1 = arith.constant 0 : i32
    return %arg0, %c0_i32, %c0_i32_0 : i32, i32, i32
  }
}

</mosaic_0001>

<bundles_post_ra>
// kernel: tpu_custom_call.1
= control target key start
LH: loop header
LB: loop body
LE: loop exit
PB: predicated region body
PF: predicated region fallthrough
CT: control target
= control target key end

     0   :  { %10 = vsyncpa [#allocation3], 0  ;;  %s1207_s0 = inlined_call_operand.hbm [shape: f32[2,32,256], index: 0, kind: input, shape index: {}]   ;;  %s1208_s1 = inlined_call_operand.vmem [shape: f32[2,32], index: 1, kind: input, shape index: {}]   ;;  %s1209_s2 = inlined_call_operand.vmem [shape: f32[2,1], index: 2, kind: input, shape index: {}]   ;;  %s1210_s3 = inlined_call_operand.vmem [shape: f32[32,2], index: 3, kind: input, shape index: {}]   ;;  %s1211_s4 = inlined_call_operand.vmem [shape: f32[32,1], index: 4, kind: input, shape index: {}]   ;;  %s1212_s5 = inlined_call_operand.hbm [shape: f32[2,32,256], index: 5, kind: output, shape index: {}]  }
   0x1   :  { %12 = vsyncpa [#allocation3 + $0x1], 0 }
   0x2   :  { %13 = vsyncpa [#allocation4], 0 }
   0x3   :  { %15 = vsyncpa [#allocation4 + $0x1], 0  ;;  %s975_s18 = smov 0   ;;  %s977_s19 = smov 0  }
   0x4   :  { %s979_s20 = smov 0   ;;  %s981_s21 = smov 0  }
   0x5 LB: > { %s996_s22 = sadd.s32 4294967295, %s934_s21   ;;  %s697_s23 = sadd.s32 4294967294, %s934_s21   ;;  %s934_s21 = sphi %s981_s21, %s1227_s21   ;;  %s930_s20 = sphi %s979_s20, %s1226_s20   ;;  %s926_s19 = sphi %s977_s19, %s1225_s19   ;;  %s922_s18 = sphi %s975_s18, %s1224_s18  }
   0x6   : > { %s1000_s24 = sadd.s32 1, %s934_s21   ;;  %s28_s25 = sadd.s32 1, %s930_s20 }
   0x7   : > { %s25_s26 = ssub.s32 %s934_s21, %s1000_s24  ;;  %p35_p0 = scmp.ne.s32.totalorder %s930_s20, %s926_s19 }
   0x8   : > { %p26_p1 = scmp.eq.s32.totalorder %s25_s26, 0  ;;  %p36_p2 = scmp.eq.s32.totalorder %s934_s21, 0 }
   0x9   : > { %p41_p3 = scmp.ne.s32.totalorder %s926_s19, %s922_s18  ;;  %p42_p4 = scmp.eq.s32.totalorder %s996_s22, 0 }
   0xa   : > { %s1012_s27 = scalar_select %p26_p1, %s930_s20, %s28_s25  }
   0xb   : > { %p1014_p5 = por %p36_p2, %p35_p0  ;;  %p1018_p6 = por %p42_p4, %p41_p3 }
   0xc   : > { %p149_p7 = scmp.eq.s32.totalorder %s996_s22, 1  ;;  %p155_p8 = scmp.eq.s32.totalorder %s697_s23, 1 }
   0xd   : > { %s1216_s29 = scalar_select %p1018_p6, 1, 0 }
   0xe   : > { %p783_p10 = scmp.lt.s32.totalorder %s934_s21, 2  ;;  %p1025_p11 = por %p149_p7, %p35_p0 }
   0xf   : > { %p1029_p12 = por %p155_p8, %p41_p3  ;;  %s187_s7 = sand.u32 1, %s930_s20  }
  0x10   : > { %s1217_s30 = scalar_select %p1025_p11, 1, 0 }
  0x11   : > { %s1218_s6 = scalar_select %p1029_p12, 1, 0 }
  0x12   : > { %s722_s8 = sshll.u32 %s934_s21, 10  ;;  %s700_s9 = sshll.u32 %s187_s7, 6 }
  0x13   : > { %s1038_s12 = scalar_lea.hbm %s1207_s0, %s722_s8  ;;  %s191_s13 = scalar_lea.vmem [#allocation2], %s700_s9 }
  0x14   : > { %s198_s14 = sshll.u32 %s191_s13, 4  ;;  %p1042_p13 = pnand %p783_p10, %p1014_p5  ;;  %s1046_s14 = int_to_ptr.vmem [resolvable:$true] %s198_s14 }
  0x15   : > { %s1048_s16 = scalar_lea.sflag [#allocation3], %s187_s7  ;;  %s842_s17 = scalar_lea.hbm %s1038_s12, 1024 }
  0x16   : > { %p843_p0 = scmp.ne.s32.totalorder %s1038_s12, %s842_s17  ;;  %p844_p1 = pneg %p1042_p13 }
  0x17   : > { %s847_s26 = scalar_lea.hbm %s1207_s0, 2048  ;;  %p848_p4 = scmp.lt.s32.totalorder %s1038_s12, %s1207_s0 }
  0x18   : > { %p845_p2 = pnand %p844_p1, %p843_p0  ;;  %p849_p5 = scmp.lt.s32.totalorder %s847_s26, %s842_s17 }
  0x1a   : > { %p846_p3 = pneg %p845_p2  ;;  %p850_p7 = por %p849_p5, %p848_p4 }
  0x1c   : > { %p851_p8 = pnand %p850_p7, %p846_p3 }
  0x1e   : > { %854 = shalt.err (!%p851_p8)
}
  0x1f   : > { %s855_s7 = scalar_lea.vmem %s1046_s14, 1024  ;;  %s936_s9 = smov [#allocation2]  }
  0x20   : > { %p856_p10 = scmp.ne.s32.totalorder %s1046_s14, %s855_s7  ;;  %s860_s10 = sshll.u32 %s936_s9, 4  ;;  %s861_s10 = int_to_ptr.vmem [resolvable:$false] %s860_s10 }
  0x21   : > { %s862_s11 = scalar_lea.vmem %s861_s10, 2048  ;;  %p863_p2 = scmp.lt.s32.totalorder %s1046_s14, %s861_s10 }
  0x22   : > { %p858_p9 = pnand %p856_p10, %p844_p1  ;;  %p864_p12 = scmp.lt.s32.totalorder %s862_s11, %s855_s7 }
  0x24   : > { %p859_p0 = pneg %p858_p9  ;;  %p865_p11 = por %p864_p12, %p863_p2 }
  0x26   : > { %p866_p6 = pnand %p865_p11, %p859_p0 }
  0x28   : > { %869 = shalt.err (!%p866_p6)
}
  0x29   : > { %s937_s13 = smov 256   ;;  %s938_s17 = smov 16  }
  0x2a   : > { %778 = dma.hbm_to_vmem [thread:$0]  (!%p1042_p13), %s1038_s12, 1024, %s1046_s14, %s1048_s16, %s937_s13, %s937_s13, %s938_s17  }
  0x2b   : > { %p703_p9 = scmp.ge.s32.totalorder %s934_s21, 1  ;;  %p206_p1 = scmp.lt.s32.totalorder %s934_s21, 3 }
  0x2d   : > { %p207_p3 = pnand %p703_p9, %p206_p1 }
  0x2e   : > { %s1072_s23 = sand.u32 (!%p207_p3), 1, %s926_s19   ;;  %p1220_p6 = scmp.ne.s32.totalorder (!%p207_p3), %s1216_s29, 0 }
  0x2f   : > { %210 = sbr.rel (%p207_p3) target bundleno = 785 (0x311), region = 40  ;;  %s704_s25 = sshll.u32 (!%p207_p3), %s1072_s23, 6 }
  0x30   : > { %s213_s26 = scalar_lea.sflag (!%p207_p3), [#allocation3], %s1072_s23  ;;  %s216_s28 = scalar_lea.vmem (!%p207_p3), [#allocation2], %s704_s25 }
  0x34   : > { %913 = dma.done.wait (%p1220_p6), %s213_s26, 1024  }
  0x35   : > { %915 = vsyncadd (%p1220_p6), %s213_s26, 4294966272  ;;  %v1082_v0 = vld [vmem:[%s216_s28 + $0x30] sm:$0xff]  ;;  %v1084_v1 = vld [vmem:[%s216_s28 + $0x38] sm:$0xff]  ;;  %v939_v16 = vmov 0.0   ;;  %vm940_vm0 = vmmov 0   ;;  %vm297_vm1 = vcmask 261120  }
  0x36   : > { %v1086_v2 = vld [vmem:[%s216_s28 + $0x20] sm:$0xff]  ;;  %v268_v3 = vadd.f32 %v1084_v1, %v1082_v0  ;;  %v280_v4 = vmax.f32 %v1082_v0, %v1084_v1  ;;  %v1092_v5 = vld [vmem:[%s216_s28 + $0x28] sm:$0xff]  ;;  %v1094_v6 = vld [vmem:[%s216_s28 + $0x10] sm:$0xff]  ;;  %739 = vmatprep.subr.mxu0 %v939_v16  ;;  %750 = vmatprep.subr.mxu1 %v939_v16  ;;  %vm448_vm2 = vcmask 15360   ;;  %vm461_vm3 = vcmask 1041408   ;;  %s242_s7 = scalar_lea.vmem [#allocation5], %s704_s25 }
  0x37   : > { %v1096_v7 = vld [vmem:[%s216_s28 + $0x18] sm:$0xff]  ;;  %v265_v8 = vadd.f32 %v1092_v5, %v1086_v2  ;;  %v1102_v10 = vld [vmem:[%s216_s28] sm:$0xff]  ;;  %v1104_v11 = vld [vmem:[%s216_s28 + $0x8] sm:$0xff]  ;;  %v277_v12 = vmax.f32 %v1086_v2, %v1092_v5  ;;  %747 = vmatprep.mubr.msk.f32.mxu0 %vm940_vm0, %v939_v16  ;;  %758 = vmatprep.mubr.msk.f32.mxu1 %vm940_vm0, %v939_v16  ;;  %v941_v44 = vmov 0   ;;  %s624_s9 = sshll.u32 %s242_s7, 4  ;;  %s723_s10 = sshll.u32 %s996_s22, 10  ;;  %s1157_s9 = int_to_ptr.vmem [resolvable:$true] %s624_s9 }
  0x38   : > { %269 = vadd.xlane.f32.xlu0 %v268_v3  ;;  %281 = vmax.xlane.f32.xlu1 %v280_v4  ;;  %v262_v9 = vadd.f32 %v1096_v7, %v1094_v6  ;;  %v259_v13 = vadd.f32 %v1104_v11, %v1102_v10  ;;  %v274_v14 = vmax.f32 %v1094_v6, %v1096_v7  ;;  %v283_v27 = vld [vmem:[%s1208_s1] sm:$0x3]  ;;  %v287_v31 = vld [vmem:[%s1210_s3 + $0x10] sm:$0xff]  ;;  %v286_v42 = vld [vmem:[%s1210_s3 + $0x8] sm:$0xff]  ;;  %s1162_s13 = scalar_lea.hbm %s1212_s5, %s723_s10  ;;  %s611_s22 = scalar_lea.sflag [#allocation4], %s1072_s23 }
  0x39   : > { %v271_v15 = vmax.f32 %v1102_v10, %v1104_v11  ;;  %v285_v30 = vld [vmem:[%s1210_s3] sm:$0xff]  ;;  %v288_v43 = vld [vmem:[%s1210_s3 + $0x18] sm:$0xff]  ;;  %825 = vset.pattern.permute.xlu1 %v941_v44  ;;  %824 = vset.pattern.permute.xlu0 %v941_v44  ;;  %v290_v45 = vld [vmem:[%s1211_s4 + $0x8] sm:$0xff]  ;;  %s870_s17 = scalar_lea.vmem %s1157_s9, 1024  ;;  %p1221_p12 = scmp.ne.s32.totalorder %s1217_s30, 0 }
  0x3a   : > { %v284_v32 = vld [vmem:[%s1209_s2] sm:$0x3]  ;;  %v292_v46 = vld [vmem:[%s1211_s4 + $0x18] sm:$0xff]  ;;  %v291_v48 = vld [vmem:[%s1211_s4 + $0x10] sm:$0xff]  ;;  %v445_v49 = vmul.f32 2.0, %v290_v45  ;;  %p871_p11 = scmp.ne.s32.totalorder %s1157_s9, %s870_s17  ;;  %s942_s26 = smov [#allocation5]  }
  0x3b   : > { %v289_v47 = vld [vmem:[%s1211_s4] sm:$0xff]  ;;  %v447_v50 = vmul.f32 2.0, %v292_v46  ;;  %v446_v52 = vmul.f32 2.0, %v291_v48  ;;  %s874_s28 = sshll.u32 %s942_s26, 4  ;;  %s875_s28 = int_to_ptr.vmem [resolvable:$false] %s874_s28 }
  0x3c   : > { %266 = vadd.xlane.f32.xlu0 %v265_v8  ;;  %263 = vadd.xlane.f32.xlu1 %v262_v9  ;;  %v444_v51 = vmul.f32 2.0, %v289_v47  ;;  %p872_p13 = pnand %p871_p11, %p1221_p12  ;;  %s876_s29 = scalar_lea.vmem %s875_s28, 2048 }
  0x3d   : > { %p877_p5 = scmp.lt.s32.totalorder %s1157_s9, %s875_s28  ;;  %p878_p7 = scmp.lt.s32.totalorder %s876_s29, %s870_s17 }
  0x3e   : > { %p873_p4 = pneg %p872_p13 }
  0x3f   : > { %p879_p8 = por %p878_p7, %p877_p5 }
  0x40   : > { %278 = vmax.xlane.f32.xlu0 %v277_v12  ;;  %260 = vadd.xlane.f32.xlu1 %v259_v13 }
  0x41   : > { %p880_p10 = pnand %p879_p8, %p873_p4 }
  0x44   : > { %275 = vmax.xlane.f32.xlu0 %v274_v14  ;;  %272 = vmax.xlane.f32.xlu1 %v271_v15 }
  0xc1   : > { %v270_v17 = vpop.xlane.xlu0 %269  ;;  %v282_v18 = vpop.xlane.xlu1 %281 }
  0xc2   : > { %v296_v19 = vmul.f32 0.00390625, %v270_v17  ;;  %751 = vmatpush3.msra.mxu1 %v282_v18 }
  0xc3   : > { %752 = vmatprep.subr.mxu1 %v939_v16 }
  0xc4   : > { %740 = vmatpush3.msra.mxu0 %v296_v19 }
  0xc5   : > { %v267_v20 = vpop.xlane.xlu0 %266  ;;  %741 = vmatprep.subr.mxu0 %v939_v16  ;;  %v264_v21 = vpop.xlane.xlu1 %263 }
  0xc6   : > { %v295_v22 = vmul.f32 0.00390625, %v267_v20  ;;  %v294_v23 = vmul.f32 0.00390625, %v264_v21 }
  0xc8   : > { %742 = vmatpush3.msra.mxu0 %v295_v22 }
  0xc9   : > { %743 = vmatprep.subr.mxu0 %v939_v16  ;;  %v279_v24 = vpop.xlane.xlu0 %278  ;;  %v261_v25 = vpop.xlane.xlu1 %260 }
  0xca   : > { %744 = vmatpush3.msra.mxu0 %v294_v23  ;;  %753 = vmatpush3.msra.mxu1 %v279_v24  ;;  %v293_v26 = vmul.f32 0.00390625, %v261_v25 }
  0xcb   : > { %754 = vmatprep.subr.mxu1 %v939_v16  ;;  %745 = vmatprep.subr.mxu0 %v939_v16 }
  0xcc   : > { %746 = vmatpush3.msra.mxu0 %v293_v26 }
  0xcd   : > { %v276_v28 = vpop.xlane.xlu0 %275  ;;  %748 = vmatmul.mubr.msk.f32.vlgmr.msra.gmra.mxu0 %vm297_vm1, %v283_v27  ;;  %v273_v29 = vpop.xlane.xlu1 %272 }
  0xce   : > { %755 = vmatpush3.msra.mxu1 %v276_v28  ;;  %763 = vmatprep.mubr.msk.f32.mxu0 %vm448_vm2, %v285_v30 }
  0xcf   : > { %756 = vmatprep.subr.mxu1 %v939_v16 }
  0xd0   : > { %757 = vmatpush3.msra.mxu1 %v273_v29 }
  0xd1   : > { %759 = vmatmul.mubr.msk.f32.vlgmr.msra.gmra.mxu1 %vm297_vm1, %v283_v27 }
  0xd2   : > { %766 = vmatprep.mubr.msk.f32.mxu1 %vm448_vm2, %v287_v31 }
 0x18d   : > { %v367_v33 = vpop.f32.mrf.mxu0 }
 0x18e   : > { %v368_v34 = vadd.f32 %v367_v33, %v284_v32 }
 0x18f   : > { %v749_v35 = vpop.f32.mrf.mxu0 }
 0x190   : > { %v371_v37 = vmax.f32 %v368_v34, 0.0 }
 0x191   : > { %v438_v36 = vpop.f32.mrf.mxu1 }
 0x192   : > { %v439_v38 = vadd.f32 %v438_v36, %v284_v32 }
 0x193   : > { %v760_v39 = vpop.f32.mrf.mxu1 }
 0x194   : > { %v442_v40 = vmax.f32 %v439_v38, 0.0 }
 0x196   : > { %v443_v41 = vadd.f32 %v442_v40, %v371_v37 }
 0x198   : > { %761 = vmatprep.subr.msk.mxu0 %vm461_vm3, %v443_v41  ;;  %769 = vmatprep.subr.msk.mxu1 %vm461_vm3, %v443_v41 }
 0x199   : > { %762 = vmatpush3.msk.msra.mxu0 %vm461_vm3, %v443_v41  ;;  %770 = vmatpush3.msk.msra.mxu1 %vm461_vm3, %v443_v41 }
 0x19a   : > { %764 = vmatmul.mubr.msk.f32.vlgmr.msra.gmra.mxu0 %vm448_vm2, %v286_v42  ;;  %767 = vmatmul.mubr.msk.f32.vlgmr.msra.gmra.mxu1 %vm448_vm2, %v288_v43 }
 0x25a   : > { %v765_v53 = vpop.f32.mrf.mxu0  ;;  %v768_v54 = vpop.f32.mrf.mxu1 }
 0x25b   : > { %v537_v55 = vadd.f32 %v765_v53, %v445_v49  ;;  %v547_v56 = vadd.f32 %v768_v54, %v447_v50 }
 0x25c   : > { %v531_v57 = vpop.f32.mrf.mxu0  ;;  %v541_v58 = vpop.f32.mrf.mxu1 }
 0x25d   : > { %v714_v59 = vmul.f32 -1.442695, %v537_v55  ;;  %v532_v60 = vadd.f32 %v531_v57, %v444_v51  ;;  %v542_v61 = vadd.f32 %v541_v58, %v446_v52  ;;  %v716_v62 = vmul.f32 -1.442695, %v547_v56 }
 0x25f   : > { %826 = vpow2.f32 %v714_v59  ;;  %v713_v63 = vmul.f32 -1.442695, %v532_v60  ;;  %v715_v3 = vmul.f32 -1.442695, %v542_v61 }
 0x261   : > { %828 = vpow2.f32 %v713_v63 }
 0x262   : > { %830 = vpow2.f32 %v715_v3 }
 0x263   : > { %832 = vpow2.f32 %v716_v62 }
 0x26c   : > { %v827_v4 = vpop.eup %826 }
 0x26d   : > { %v563_v8 = vadd.f32 1.0, %v827_v4 }
 0x26e   : > { %v829_v9 = vpop.eup %828 }
 0x26f   : > { %v831_v12 = vpop.eup %830  ;;  %834 = vrcp.f32 %v563_v8  ;;  %v562_v13 = vadd.f32 1.0, %v829_v9 }
 0x270   : > { %v833_v14 = vpop.eup %832  ;;  %v564_v15 = vadd.f32 1.0, %v831_v12 }
 0x271   : > { %836 = vrcp.f32 %v562_v13  ;;  %v565_v16 = vadd.f32 1.0, %v833_v14 }
 0x272   : > { %838 = vrcp.f32 %v564_v15 }
 0x273   : > { %840 = vrcp.f32 %v565_v16 }
 0x27c   : > { %v835_v17 = vpop.eup %834 }
 0x27d   : > { %581 = vperm.xlu1 %825, %v835_v17  }
 0x27e   : > { %v837_v18 = vpop.eup %836 }
 0x27f   : > { %576 = vperm.xlu0 %824, %v837_v18   ;;  %v839_v19 = vpop.eup %838 }
 0x280   : > { %v841_v20 = vpop.eup %840 }
 0x281   : > { %586 = vperm.xlu1 %825, %v839_v19  }
 0x285   : > { %591 = vperm.xlu1 %825, %v841_v20  }
 0x2f8   : > { %v582_v21 = vpop.permute.xlu1 %581 }
 0x2f9   : > { %v596_v22 = vmul.f32 %v582_v21, %v1094_v6  ;;  %v597_v23 = vmul.f32 %v582_v21, %v1096_v7 }
 0x2fa   : > { %v577_v24 = vpop.permute.xlu0 %576 }
 0x2fb   : > { %604 = vst [vmem:[%s242_s7 + $0x10] sm:$0xff] %v596_v22  ;;  %605 = vst [vmem:[%s242_s7 + $0x18] sm:$0xff] %v597_v23  ;;  %v594_v25 = vmul.f32 %v577_v24, %v1102_v10  ;;  %v595_v26 = vmul.f32 %v577_v24, %v1104_v11 }
 0x2fc   : > { %v587_v27 = vpop.permute.xlu1 %586 }
 0x2fd   : > { %602 = vst [vmem:[%s242_s7] sm:$0xff] %v594_v25  ;;  %603 = vst [vmem:[%s242_s7 + $0x8] sm:$0xff] %v595_v26  ;;  %v598_v28 = vmul.f32 %v587_v27, %v1086_v2  ;;  %v599_v6 = vmul.f32 %v587_v27, %v1092_v5 }
 0x2ff   : > { %606 = vst [vmem:[%s242_s7 + $0x20] sm:$0xff] %v598_v28  ;;  %607 = vst [vmem:[%s242_s7 + $0x28] sm:$0xff] %v599_v6 }
 0x300   : > { %v592_v7 = vpop.permute.xlu1 %591 }
 0x301   : > { %v600_v10 = vmul.f32 %v592_v7, %v1082_v0  ;;  %v601_v2 = vmul.f32 %v592_v7, %v1084_v1 }
 0x303   : > { %608 = vst [vmem:[%s242_s7 + $0x30] sm:$0xff] %v600_v10  ;;  %609 = vst [vmem:[%s242_s7 + $0x38] sm:$0xff] %v601_v2 }
 0x304   : > { %883 = shalt.err (!%p880_p10)
}
 0x305   : > { %s884_s12 = scalar_lea.hbm %s1162_s13, 1024  ;;  %s888_s16 = scalar_lea.hbm %s1212_s5, 2048 }
 0x306   : > { %p885_p0 = scmp.ne.s32.totalorder %s1162_s13, %s884_s12  ;;  %p889_p1 = scmp.lt.s32.totalorder %s1162_s13, %s1212_s5 }
 0x307   : > { %p890_p3 = scmp.lt.s32.totalorder %s888_s16, %s884_s12 }
 0x308   : > { %p886_p2 = pnand %p885_p0, %p1221_p12 }
 0x309   : > { %p891_p6 = por %p890_p3, %p889_p1 }
 0x30a   : > { %p887_p9 = pneg %p886_p2 }
 0x30c   : > { %p892_p11 = pnand %p891_p6, %p887_p9 }
 0x30e   : > { %895 = shalt.err (!%p892_p11)
}
 0x30f   : > { %s943_s10 = smov 256   ;;  %s944_s25 = smov 16  }
 0x310   : > { %773 = dma.vmem_to_hbm [thread:$0]  (%p1221_p12), %s1157_s9, 1024, %s1162_s13, %s611_s22, %s943_s10, %s943_s10, %s944_s25  }
 0x311 PF: > { %s639_s11 = sand.u32 1, %s922_s18   ;;  %p1222_p13 = scmp.ne.s32.totalorder %s1218_s6, 0 }
 0x312   : > { %p1223_p4 = scmp.ge.s32.totalorder %s934_s21, 2  ;;  %s640_s17 = scalar_lea.sflag [#allocation4], %s639_s11 }
 0x314   : > { %p780_p5 = pnand %p1223_p4, %p1222_p13 }
 0x316   : > { %p781_p7 = pneg %p780_p5 }
 0x318   : > { %917 = dma.done.wait (%p781_p7), %s640_s17, 1024  }
 0x319   : > { %919 = vsyncadd (%p781_p7), %s640_s17, 4294966272  ;;  %p18_p8 = scmp.ge.s32.totalorder %s1000_s24, 4   ;;  %s1224_s18 = smov %s926_s19 }
 0x31a   : > { %s1225_s19 = smov %s930_s20  ;;  %s1226_s20 = smov %s1012_s27 }
 0x31b   : > { %s1227_s21 = smov %s1000_s24  ;;  %20 = sbr.rel (!%p18_p8) target bundleno = 5 (0x5), region = 85 }
 0x320   :  { %645 = vsyncpa [#allocation3], 1 }
 0x321   :  { %647 = vsyncpa [#allocation3 + $0x1], 1 }
 0x322   :  { %648 = vsyncpa [#allocation4], 1 }
 0x323   :  { %650 = vsyncpa [#allocation4 + $0x1], 1 }

</bundles_post_ra>
